<compile_context>
chip_gen: v5e
topology: v5e:2x2
jax: 0.10.0
libtpu: 0.0.40
codegen_flags: <defaults>
</compile_context>

<pallas_src>
import functools
import math

import jax
import jax.numpy as jnp
from jax.experimental import pallas as pl
from jax.experimental.pallas import tpu as pltpu


def _rmsnorm_kernel(x_ref, w_ref, o_ref, *, eps):
    # x_ref: [tile_rows, D], w_ref: [1, D], o_ref: [tile_rows, D]
    x = x_ref[...].astype(jnp.float32)
    var = jnp.mean(x * x, axis=-1, keepdims=True)          # [tile_rows, 1]
    inv = jax.lax.rsqrt(var + eps)                          # EUP rsqrt
    y = (x * inv).astype(o_ref.dtype)                       # cast back to input dtype
    o_ref[...] = w_ref[...].astype(o_ref.dtype) * y         # learned gamma


def _round_up(n, m):
    return ((n + m - 1) // m) * m


def llama_rms_norm(x, weight, *, eps=1e-5, tile_budget_bytes=6 * 1024 * 1024):
    """RMSNorm over the last axis of `x` with per-channel `weight` (LlamaRMSNorm)."""
    orig_shape = x.shape
    d = orig_shape[-1]
    rows = math.prod(orig_shape[:-1]) if len(orig_shape) > 1 else 1

    # Lane-sparse hidden sizes: masked partial stores waste most of every vreg;
    # plain JAX (fused by XLA) is faster than a per-row pallas_call here.
    if d < 128:
        x32 = x.astype(jnp.float32)
        var = jnp.mean(x32 * x32, axis=-1, keepdims=True)
        y = (x32 * jax.lax.rsqrt(var + eps)).astype(x.dtype)
        return weight.astype(x.dtype) * y

    itemsize = jnp.dtype(x.dtype).itemsize
    # dtype-dependent sublane packing minimum: f32 -> 8, bf16 -> 16, int8/fp8 -> 32
    sublane_min = {4: 8, 2: 16, 1: 32}.get(itemsize, 8)

    # Largest row tile that keeps each pipeline buffer under the budget.
    # Total VMEM ~= (in + out) * 2 pipeline buffers * tile_bytes + weight.
    row_bytes = d * itemsize
    tile_rows = max(sublane_min,
                    (tile_budget_bytes // row_bytes) // sublane_min * sublane_min)
    tile_rows = min(tile_rows, _round_up(rows, sublane_min))

    # Pad rows to a tile multiple (zeros are safe: var=0 -> rsqrt(eps) is finite),
    # instead of collapsing to one giant unpipelined block.
    rows_padded = _round_up(rows, tile_rows)
    x2 = x.reshape(rows, d)
    if rows_padded != rows:
        x2 = jnp.pad(x2, ((0, rows_padded - rows), (0, 0)))
    w2 = weight.reshape(1, d)

    grid = (rows_padded // tile_rows,)

    tile_bytes = tile_rows * row_bytes
    # 4 tile buffers (in/out, double-buffered) + weight + compiler scratch, with
    # headroom; capped well below v7x's 64 MiB physical VMEM.
    vmem_limit = int(min(max(4 * tile_bytes + 4 * row_bytes + (4 << 20), 32 << 20),
                         48 << 20))

    out2 = pl.pallas_call(
        functools.partial(_rmsnorm_kernel, eps=float(eps)),
        out_shape=jax.ShapeDtypeStruct((rows_padded, d), x.dtype),
        grid_spec=pltpu.PrefetchScalarGridSpec(
            num_scalar_prefetch=0,
            grid=grid,
            in_specs=[
                pl.BlockSpec((tile_rows, d), lambda i: (i, 0)),
                pl.BlockSpec((1, d), lambda i: (0, 0)),      # weight resident
            ],
            out_specs=pl.BlockSpec((tile_rows, d), lambda i: (i, 0)),
        ),
        compiler_params=pltpu.CompilerParams(
            dimension_semantics=("parallel",),               # v7x: 2 TCs split rows
            vmem_limit_bytes=vmem_limit,
        ),
        cost_estimate=pl.CostEstimate(
            flops=4 * rows_padded * d,
            transcendentals=rows_padded,
            bytes_accessed=2 * rows_padded * d * itemsize + d * itemsize,
        ),
    )(x2, w2)

    if rows_padded != rows:
        out2 = out2[:rows]
    return out2.reshape(orig_shape)


def _reference(x, weight, eps):
    x32 = x.astype(jnp.float32)
    var = jnp.mean(x32 * x32, axis=-1, keepdims=True)
    y = (x32 * jax.lax.rsqrt(var + eps)).astype(x.dtype)
    return weight.astype(x.dtype) * y


if __name__ == "__main__":
    key = jax.random.PRNGKey(0)
    k1, k2, k3 = jax.random.split(key, 3)
    eps = 1e-5

    # [batch, seq, hidden] — hidden >= 128 so the lane axis is dense.
    hidden = 256
    x = jax.random.normal(k1, (2, 8, hidden), dtype=jnp.float32)
    weight = 1.0 + 0.1 * jax.random.normal(k2, (hidden,), dtype=jnp.float32)

    out = jax.block_until_ready(llama_rms_norm(x, weight, eps=eps))
    ref = _reference(x, weight, eps)
    assert out.shape == x.shape and out.dtype == x.dtype
    assert jnp.allclose(out, ref, atol=1e-5, rtol=1e-5)

    # Row count that is not a multiple of the tile (exercises the padding path).
    x_odd = jax.random.normal(k3, (3, 5, hidden), dtype=jnp.float32)
    out_odd = jax.block_until_ready(llama_rms_norm(x_odd, weight, eps=eps))
    ref_odd = _reference(x_odd, weight, eps)
    assert jnp.allclose(out_odd, ref_odd, atol=1e-5, rtol=1e-5)

    print("KERNEL_OK")
</pallas_src>

<mosaic_0001>
module attributes {stable_mosaic.version = 11 : i64} {
  func.func @_rmsnorm_kernel(%arg0: i32, %arg1: memref<16x256xf32, #tpu.memory_space<vmem>>, %arg2: memref<1x256xf32, #tpu.memory_space<vmem>>, %arg3: memref<16x256xf32, #tpu.memory_space<vmem>>) attributes {dimension_semantics = [#tpu.dimension_semantics<parallel>], iteration_bounds = array<i64: 1>, scalar_prefetch = 0 : i64, scratch_operands = 0 : i64, tpu.core_type = #tpu.core_type<tc>, window_params = [{transform_indices = @transform_0, window_bounds = array<i64: 16, 256>}, {pipeline_mode = #tpu.pipeline_mode<synchronous>, transform_indices = @transform_1, window_bounds = array<i64: 1, 256>}, {transform_indices = @transform_2, window_bounds = array<i64: 16, 256>}]} {
    %c0 = arith.constant 0 : index
    %c0_0 = arith.constant 0 : index
    %0 = vector.load %arg1[%c0, %c0_0] : memref<16x256xf32, #tpu.memory_space<vmem>>, vector<16x256xf32>
    %1 = arith.mulf %0, %0 : vector<16x256xf32>
    %cst = arith.constant dense<0.000000e+00> : vector<16xf32>
    %2 = vector.multi_reduction <add>, %1, %cst [1] : vector<16x256xf32> to vector<16xf32>
    %3 = vector.shape_cast %2 : vector<16xf32> to vector<16x1xf32>
    %cst_1 = arith.constant 2.560000e+02 : f32
    %4 = vector.broadcast %cst_1 : f32 to vector<16x1xf32>
    %5 = arith.divf %3, %4 : vector<16x1xf32>
    %cst_2 = arith.constant 9.99999974E-6 : f32
    %6 = vector.broadcast %cst_2 : f32 to vector<16x1xf32>
    %7 = arith.addf %5, %6 : vector<16x1xf32>
    %8 = math.rsqrt %7 : vector<16x1xf32>
    %9 = vector.broadcast %8 : vector<16x1xf32> to vector<16x256xf32>
    %10 = arith.mulf %0, %9 : vector<16x256xf32>
    %c0_3 = arith.constant 0 : index
    %c0_4 = arith.constant 0 : index
    %11 = vector.load %arg2[%c0_3, %c0_4] : memref<1x256xf32, #tpu.memory_space<vmem>>, vector<1x256xf32>
    %12 = vector.broadcast %11 : vector<1x256xf32> to vector<16x256xf32>
    %13 = arith.mulf %12, %10 : vector<16x256xf32>
    %c0_5 = arith.constant 0 : index
    %c0_6 = arith.constant 0 : index
    %14 = vector.load %arg3[%c0_5, %c0_6] : memref<16x256xf32, #tpu.memory_space<vmem>>, vector<16x256xf32>
    tpu.vector_store %arg3[%c0_5, %c0_6], %13 {strides = array<i32>} : memref<16x256xf32, #tpu.memory_space<vmem>>, vector<16x256xf32>,
    return
  }
  func.func @transform_0(%arg0: i32) -> (i32, i32) {
    %c0_i32 = arith.constant 0 : i32
    %c0_i32_0 = arith.constant 0 : i32
    return %arg0, %c0_i32 : i32, i32
  }
  func.func @transform_1(%arg0: i32) -> (i32, i32) {
    %c0_i32 = arith.constant 0 : i32
    %c0_i32_0 = arith.constant 0 : i32
    %c0_i32_1 = arith.constant 0 : i32
    return %c0_i32, %c0_i32_0 : i32, i32
  }
  func.func @transform_2(%arg0: i32) -> (i32, i32) {
    %c0_i32 = arith.constant 0 : i32
    %c0_i32_0 = arith.constant 0 : i32
    return %arg0, %c0_i32 : i32, i32
  }
}

</mosaic_0001>

<bundles_post_ra>
// kernel: tpu_custom_call.1
= control target key start
LH: loop header
LB: loop body
LE: loop exit
PB: predicated region body
PF: predicated region fallthrough
CT: control target
= control target key end

     0   :  { %7 = vsyncpa [#allocation3], 0  ;;  %s251_s0 = inlined_call_operand.hbm [shape: f32[16,256], index: 0, kind: input, shape index: {}]   ;;  %s252_s1 = inlined_call_operand.hbm [shape: f32[1,256], index: 1, kind: input, shape index: {}]   ;;  %s253_s2 = inlined_call_operand.hbm [shape: f32[16,256], index: 2, kind: output, shape index: {}]  }
   0x1   :  { %8 = vsyncpa [#allocation6], 0 }
   0x2   :  { %9 = vsyncpa [#allocation4], 0  ;;  %s14_s11 = sshll.u32 %s251_s0, 4  ;;  %s215_s12 = smov [#allocation2]   ;;  %s15_s11 = int_to_ptr.hbm [resolvable:$true] %s14_s11 }
   0x3   :  { %s16_s13 = sshll.u32 %s215_s12, 4  ;;  %s28_s16 = sshll.u32 %s252_s1, 4  ;;  %s17_s13 = int_to_ptr.vmem [resolvable:$true] %s16_s13  ;;  %s29_s16 = int_to_ptr.hbm [resolvable:$true] %s28_s16 }
   0x4   :  { %s216_s17 = smov 256   ;;  %s217_s18 = smov 16  }
   0x5   :  { %22 = dma.hbm_to_vmem [thread:$0]  %s15_s11, 512, %s17_s13, [#allocation3], %s216_s17, %s216_s17, %s217_s18  }
   0x6   :  { %s218_s19 = smov [#allocation5]  }
   0x7   :  { %s30_s20 = sshll.u32 %s218_s19, 4  ;;  %s31_s20 = int_to_ptr.vmem [resolvable:$true] %s30_s20 }
   0x8   :  { %33 = dma.hbm_to_vmem [thread:$0]  %s29_s16, 32, %s31_s20, [#allocation6]  }
   0x9   :  { %209 = dma.done.wait [#allocation3], 512  }
   0xa   :  { %210 = vsyncadd [#allocation3], 4294966784 }
   0xb   :  { %211 = dma.done.wait [#allocation6], 32  }
   0xc   :  { %212 = vsyncadd [#allocation6], 4294967264  ;;  %v42_v0 = vld [vmem:[#allocation2] sm:$0xff]  ;;  %v43_v1 = vld [vmem:[#allocation2 + $0x8] sm:$0xff]  ;;  %v219_v10 = vmov 256.0   ;;  %s220_s0 = smov [#allocation7]  }
   0xd   :  { %v46_v2 = vmul.f32 %v42_v0, %v42_v0  ;;  %v47_v3 = vmul.f32 %v43_v1, %v43_v1  ;;  %v44_v4 = vld [vmem:[#allocation2 + $0x10] sm:$0xff]  ;;  %v45_v5 = vld [vmem:[#allocation2 + $0x18] sm:$0xff]  ;;  %131 = vrcp.f32 %v219_v10  ;;  %v91_v27 = vld [vmem:[#allocation5] sm:$0x3]  ;;  %s109_s1 = sshll.u32 %s220_s0, 4  ;;  %s111_s23 = sshll.u32 %s253_s2, 4  ;;  %s110_s1 = int_to_ptr.vmem [resolvable:$true] %s109_s1  ;;  %s112_s23 = int_to_ptr.hbm [resolvable:$true] %s111_s23 }
   0xe   :  { %v48_v7 = vmul.f32 %v44_v4, %v44_v4  ;;  %v49_v8 = vmul.f32 %v45_v5, %v45_v5  ;;  %v93_v32 = vperm.slane %v91_v27, 0  ;;  %v94_v33 = vperm.slane %v91_v27, 1 }
   0xf   :  { %v50_v6 = vadd.f32 %v47_v3, %v46_v2 }
  0x10   :  { %v53_v9 = vadd.f32 %v49_v8, %v48_v7 }
  0x11   :  { %51 = vadd.xlane.f32.xlu0 %v50_v6 }
  0x13   :  { %v132_v11 = vpop.eup %131 }
  0x14   :  { %v57_v12 = vmul.f32 256.0, %v132_v11  ;;  %vm61_vm0 = vweird.f32 %v132_v11 }
  0x16   :  { %v58_v13 = vsub.f32 1.0, %v57_v12 }
  0x18   :  { %v59_v14 = vmul.f32 %v132_v11, %v58_v13 }
  0x19   :  { %54 = vadd.xlane.f32.xlu0 %v53_v9 }
  0x1a   :  { %v60_v15 = vadd.f32 %v132_v11, %v59_v14 }
  0x1c   :  { %v62_v16 = vsel %vm61_vm0, %v132_v11, %v60_v15 }
  0x84   :  { %v52_v17 = vpop.xlane.xlu0 %51 }
  0x85   :  { %v63_v18 = vmul.f32 %v62_v16, %v52_v17 }
  0x87   :  { %v65_v19 = vadd.f32 1e-05, %v63_v18 }
  0x89   :  { %133 = vrsqrt.f32 %v65_v19  ;;  %vm73_vm2 = vweird.f32 %v65_v19 }
  0x8c   :  { %v55_v20 = vpop.xlane.xlu0 %54 }
  0x8d   :  { %v64_v21 = vmul.f32 %v62_v16, %v55_v20 }
  0x8f   :  { %v134_v22 = vpop.eup %133  ;;  %v66_v23 = vadd.f32 1e-05, %v64_v21 }
  0x90   :  { %v68_v24 = vmul.f32 %v134_v22, %v65_v19  ;;  %vm74_vm1 = vweird.f32 %v134_v22 }
  0x91   :  { %135 = vrsqrt.f32 %v66_v23  ;;  %vm75_vm3 = vmor %vm73_vm2, %vm74_vm1  ;;  %vm83_vm5 = vweird.f32 %v66_v23 }
  0x92   :  { %v69_v25 = vmul.f32 %v134_v22, %v68_v24 }
  0x94   :  { %v70_v26 = vmul.f32 0.5, %v69_v25 }
  0x96   :  { %v71_v28 = vsub.f32 1.5, %v70_v26 }
  0x97   :  { %v136_v29 = vpop.eup %135 }
  0x98   :  { %v72_v30 = vmul.f32 %v134_v22, %v71_v28  ;;  %v78_v31 = vmul.f32 %v136_v29, %v66_v23  ;;  %vm84_vm4 = vweird.f32 %v136_v29 }
  0x99   :  { %vm85_vm6 = vmor %vm83_vm5, %vm84_vm4 }
  0x9a   :  { %v76_v34 = vsel %vm75_vm3, %v134_v22, %v72_v30  ;;  %v79_v35 = vmul.f32 %v136_v29, %v78_v31 }
  0x9b   :  { %v87_v36 = vmul.f32 %v76_v34, %v42_v0  ;;  %v88_v37 = vmul.f32 %v76_v34, %v43_v1 }
  0x9c   :  { %v80_v38 = vmul.f32 0.5, %v79_v35 }
  0x9d   :  { %v97_v39 = vmul.f32 %v93_v32, %v87_v36  ;;  %v98_v40 = vmul.f32 %v94_v33, %v88_v37 }
  0x9e   :  { %v81_v41 = vsub.f32 1.5, %v80_v38 }
  0x9f   :  { %101 = vst [vmem:[#allocation7] sm:$0xff] %v97_v39 }
  0xa0   :  { %102 = vst [vmem:[#allocation7 + $0x8] sm:$0xff] %v98_v40  ;;  %v82_v42 = vmul.f32 %v136_v29, %v81_v41 }
  0xa2   :  { %v86_v43 = vsel %vm85_vm6, %v136_v29, %v82_v42 }
  0xa3   :  { %v89_v44 = vmul.f32 %v86_v43, %v44_v4  ;;  %v90_v45 = vmul.f32 %v86_v43, %v45_v5 }
  0xa5   :  { %v99_v46 = vmul.f32 %v93_v32, %v89_v44  ;;  %v100_v47 = vmul.f32 %v94_v33, %v90_v45 }
  0xa7   :  { %103 = vst [vmem:[#allocation7 + $0x10] sm:$0xff] %v99_v46 }
  0xa8   :  { %104 = vst [vmem:[#allocation7 + $0x18] sm:$0xff] %v100_v47 }
  0xa9   :  { %117 = dma.vmem_to_hbm [thread:$0]  %s110_s1, 512, %s112_s23, [#allocation4], %s216_s17, %s216_s17, %s217_s18  }
  0xaa   :  { %213 = dma.done.wait [#allocation4], 512  }
  0xab   :  { %214 = vsyncadd [#allocation4], 4294966784 }
  0xac   :  { %122 = vsyncpa [#allocation3], 1 }
  0xad   :  { %123 = vsyncpa [#allocation6], 1 }
  0xae   :  { %124 = vsyncpa [#allocation4], 1 }

</bundles_post_ra>
